<compile_context>
chip_gen: v6e
topology: v6e:2x2x1
jax: 0.10.0
libtpu: 0.0.40
codegen_flags: <defaults>
</compile_context>

<pallas_src>
import math

import jax
import jax.numpy as jnp
from jax.experimental import pallas as pl
from jax.experimental.pallas import tpu as pltpu


def _round_up(n, m):
    return ((n + m - 1) // m) * m


def _vae_kernel(
    x_ref, eps_ref,
    w1_ref, b1_ref,
    wmulv_ref, bmulv_ref,
    wd1_ref, bd1_ref,
    wd2_ref, bd2_ref,
    recon_ref, mulv_ref,
):
    lat_pad = eps_ref.shape[1]          # static (128 for latent_dim=32)

    x = x_ref[...]                      # (TB, D_PAD)   bf16
    eps = eps_ref[...]                  # (TB, LAT_PAD) f32 (padded lanes are 0)

    # --- encoder fc1 + ReLU (bf16 MXU inputs, f32 accumulate, f32 elementwise) ---
    h1 = jnp.dot(x, w1_ref[...], preferred_element_type=jnp.float32) + b1_ref[...]
    h1 = jnp.maximum(h1, 0.0)                                   # (TB, 128) f32

    # --- fused mu/logvar head: one (128, 2*LAT_PAD) matmul, lane-dense output ---
    mulv = jnp.dot(h1.astype(jnp.bfloat16), wmulv_ref[...],
                   preferred_element_type=jnp.float32) + bmulv_ref[...]
    mulv_ref[...] = mulv.astype(mulv_ref.dtype)                 # (TB, 2*LAT_PAD) bf16 out

    mu = mulv[:, :lat_pad]              # 128-lane-aligned static slices (f32)
    logvar = mulv[:, lat_pad:]

    # --- reparameterize: z = mu + eps * exp(0.5 * logvar); padded lanes stay 0 ---
    z = mu + eps * jnp.exp(0.5 * logvar)                        # (TB, LAT_PAD) f32

    # --- decoder fc1 + ReLU ---
    h3 = jnp.dot(z.astype(jnp.bfloat16), wd1_ref[...],
                 preferred_element_type=jnp.float32) + bd1_ref[...]
    h3 = jnp.maximum(h3, 0.0)                                   # (TB, 128) f32

    # --- decoder fc2 + sigmoid via tanh identity (single EUP op per vreg) ---
    logits = jnp.dot(h3.astype(jnp.bfloat16), wd2_ref[...],
                     preferred_element_type=jnp.float32) + bd2_ref[...]
    recon = 0.5 * jnp.tanh(0.5 * logits) + 0.5                  # exact sigmoid, in (0,1)
    recon_ref[...] = recon.astype(recon_ref.dtype)              # bf16 store


def _choose_tile(batch):
    """Pick a sublane-aligned batch tile: <=512 rows, >=2 grid steps when possible."""
    b8 = _round_up(batch, 8)
    if b8 <= 8:
        return 8, 8
    tb = min(512, _round_up((b8 + 1) // 2, 8))
    b_pad = _round_up(b8, tb)
    return tb, b_pad


@jax.jit
def vae_forward(x, eps, packed):
    """x: (B, input_dim) f32, eps: (B, latent_dim) f32, packed: pack_params() dict."""
    B, input_dim = x.shape
    latent_dim = eps.shape[1]
    d_pad = packed["w1"].shape[0]        # 128-multiple padded input dim
    hidden = packed["w1"].shape[1]       # 128
    lat_pad = packed["wd1"].shape[0]     # 128-multiple padded latent dim

    tb, b_pad = _choose_tile(B)

    # Single fused pads (no zeros + scatter round trips).
    x_p = jnp.pad(x.astype(jnp.bfloat16),
                  ((0, b_pad - B), (0, d_pad - input_dim)))
    eps_p = jnp.pad(eps, ((0, b_pad - B), (0, lat_pad - latent_dim)))

    def row_spec(shape):
        return pl.BlockSpec(shape, lambda i: (i, 0))

    def const_spec(shape):
        return pl.BlockSpec(shape, lambda i: (0, 0))

    # VMEM budget: double-buffered per-row I/O + resident weights + f32 intermediates.
    bytes_per_row = d_pad * 2 + lat_pad * 4 + d_pad * 2 + 2 * lat_pad * 2
    weight_bytes = (d_pad * hidden + hidden * 2 * lat_pad
                    + lat_pad * hidden + hidden * d_pad) * 2 \
        + (hidden + 2 * lat_pad + hidden + d_pad) * 4
    interm_bytes = tb * (hidden + 2 * lat_pad + lat_pad + hidden + d_pad) * 4
    vmem_est = 2 * tb * bytes_per_row + 2 * weight_bytes + interm_bytes
    vmem_limit = int(min(48 * 1024 * 1024, max(32 * 1024 * 1024, 2 * vmem_est)))

    recon_p, mulv_p = pl.pallas_call(
        _vae_kernel,
        grid=(b_pad // tb,),
        in_specs=[
            row_spec((tb, d_pad)),               # x tile
            row_spec((tb, lat_pad)),             # eps tile
            const_spec((d_pad, hidden)),         # w1   (resident)
            const_spec((1, hidden)),             # b1
            const_spec((hidden, 2 * lat_pad)),   # wmulv (fused mu|logvar)
            const_spec((1, 2 * lat_pad)),        # bmulv
            const_spec((lat_pad, hidden)),       # wd1
            const_spec((1, hidden)),             # bd1
            const_spec((hidden, d_pad)),         # wd2
            const_spec((1, d_pad)),              # bd2
        ],
        out_specs=(
            row_spec((tb, d_pad)),               # recon (lane-dense, padded, bf16)
            row_spec((tb, 2 * lat_pad)),         # mu|logvar slab (lane-dense, bf16)
        ),
        out_shape=(
            jax.ShapeDtypeStruct((b_pad, d_pad), jnp.bfloat16),
            jax.ShapeDtypeStruct((b_pad, 2 * lat_pad), jnp.bfloat16),
        ),
        compiler_params=pltpu.CompilerParams(
            dimension_semantics=("parallel",),
            vmem_limit_bytes=vmem_limit),
    )(
        x_p, eps_p,
        packed["w1"], packed["b1"],
        packed["wmulv"], packed["bmulv"],
        packed["wd1"], packed["bd1"],
        packed["wd2"], packed["bd2"],
    )

    recon = recon_p[:B, :input_dim]
    mu = mulv_p[:B, :latent_dim]
    logvar = mulv_p[:B, lat_pad:lat_pad + latent_dim]
    return recon, mu, logvar


def init_params(key, input_dim, latent_dim, hidden=128):
    """PyTorch-style init; weights stored as (in_features, out_features) == W.T."""
    def linear(k, fan_in, fan_out):
        kw, kb = jax.random.split(k)
        bound = 1.0 / math.sqrt(fan_in)
        w = jax.random.uniform(kw, (fan_in, fan_out), jnp.float32, -bound, bound)
        b = jax.random.uniform(kb, (1, fan_out), jnp.float32, -bound, bound)
        return w, b

    k1, k2, k3, k4, k5 = jax.random.split(key, 5)
    w1, b1 = linear(k1, input_dim, hidden)
    wmu, bmu = linear(k2, hidden, latent_dim)
    wlv, blv = linear(k3, hidden, latent_dim)
    wd1, bd1 = linear(k4, latent_dim, hidden)
    wd2, bd2 = linear(k5, hidden, input_dim)
    return dict(w1=w1, b1=b1, wmu=wmu, bmu=bmu, wlv=wlv, blv=blv,
                wd1=wd1, bd1=bd1, wd2=wd2, bd2=bd2)


def pack_params(p, input_dim, latent_dim, hidden=128):
    """Pad feature dims to 128 multiples, fuse mu/logvar head, cast weights to bf16."""
    d_pad = _round_up(input_dim, 128)
    lat_pad = _round_up(latent_dim, 128)

    def pad2(a, shape):
        out = jnp.zeros(shape, a.dtype)
        return out.at[:a.shape[0], :a.shape[1]].set(a)

    w1 = pad2(p["w1"], (d_pad, hidden)).astype(jnp.bfloat16)
    b1 = p["b1"].astype(jnp.float32)
    wmulv = jnp.concatenate(
        [pad2(p["wmu"], (hidden, lat_pad)), pad2(p["wlv"], (hidden, lat_pad))],
        axis=1).astype(jnp.bfloat16)
    bmulv = jnp.concatenate(
        [pad2(p["bmu"], (1, lat_pad)), pad2(p["blv"], (1, lat_pad))],
        axis=1).astype(jnp.float32)
    wd1 = pad2(p["wd1"], (lat_pad, hidden)).astype(jnp.bfloat16)
    bd1 = p["bd1"].astype(jnp.float32)
    wd2 = pad2(p["wd2"], (hidden, d_pad)).astype(jnp.bfloat16)
    bd2 = pad2(p["bd2"], (1, d_pad)).astype(jnp.float32)
    return dict(w1=w1, b1=b1, wmulv=wmulv, bmulv=bmulv,
                wd1=wd1, bd1=bd1, wd2=wd2, bd2=bd2)


def vae_ref(x, eps, p):
    """Pure-JAX f32 reference for correctness checking."""
    h1 = jnp.maximum(x @ p["w1"] + p["b1"], 0.0)
    mu = h1 @ p["wmu"] + p["bmu"]
    logvar = h1 @ p["wlv"] + p["blv"]
    z = mu + eps * jnp.exp(0.5 * logvar)
    h3 = jnp.maximum(z @ p["wd1"] + p["bd1"], 0.0)
    recon = jax.nn.sigmoid(h3 @ p["wd2"] + p["bd2"])
    return recon, mu, logvar


if __name__ == "__main__":
    # Small shapes consistent with the module's forward: x of shape (B, input_dim).
    B, INPUT_DIM, LATENT_DIM = 8, 784, 32

    root = jax.random.PRNGKey(0)
    k_x, k_eps, k_params = jax.random.split(root, 3)

    x = jax.random.normal(k_x, (B, INPUT_DIM), jnp.float32)
    # eps is the random draw from torch.randn_like(std); sampled host-side for determinism.
    eps = jax.random.normal(k_eps, (B, LATENT_DIM), jnp.float32)
    params = init_params(k_params, INPUT_DIM, LATENT_DIM)
    packed = pack_params(params, INPUT_DIM, LATENT_DIM)

    recon, mu, logvar = vae_forward(x, eps, packed)
    jax.block_until_ready((recon, mu, logvar))

    # Correctness check vs. pure-f32 reference (tolerance covers bf16 matmuls and
    # bf16 output stores).
    r_ref, mu_ref, lv_ref = vae_ref(x, eps, params)
    assert recon.shape == (B, INPUT_DIM) and mu.shape == (B, LATENT_DIM)
    assert logvar.shape == (B, LATENT_DIM)
    assert jnp.allclose(recon.astype(jnp.float32), r_ref, atol=3e-2, rtol=3e-2)
    assert jnp.allclose(mu.astype(jnp.float32), mu_ref, atol=3e-2, rtol=3e-2)
    assert jnp.allclose(logvar.astype(jnp.float32), lv_ref, atol=3e-2, rtol=3e-2)

    print("KERNEL_OK")
</pallas_src>

<mosaic_0001>
module attributes {stable_mosaic.version = 11 : i64} {
  func.func @_vae_kernel(%arg0: i32, %arg1: memref<8x896xbf16, #tpu.memory_space<vmem>>, %arg2: memref<8x128xf32, #tpu.memory_space<vmem>>, %arg3: memref<896x128xbf16, #tpu.memory_space<vmem>>, %arg4: memref<1x128xf32, #tpu.memory_space<vmem>>, %arg5: memref<128x256xbf16, #tpu.memory_space<vmem>>, %arg6: memref<1x256xf32, #tpu.memory_space<vmem>>, %arg7: memref<128x128xbf16, #tpu.memory_space<vmem>>, %arg8: memref<1x128xf32, #tpu.memory_space<vmem>>, %arg9: memref<128x896xbf16, #tpu.memory_space<vmem>>, %arg10: memref<1x896xf32, #tpu.memory_space<vmem>>, %arg11: memref<8x896xbf16, #tpu.memory_space<vmem>>, %arg12: memref<8x256xbf16, #tpu.memory_space<vmem>>) attributes {dimension_semantics = [#tpu.dimension_semantics<parallel>], iteration_bounds = array<i64: 1>, scalar_prefetch = 0 : i64, scratch_operands = 0 : i64, tpu.core_type = #tpu.core_type<tc>, window_params = [{transform_indices = @transform_0, window_bounds = array<i64: 8, 896>}, {transform_indices = @transform_1, window_bounds = array<i64: 8, 128>}, {pipeline_mode = #tpu.pipeline_mode<synchronous>, transform_indices = @transform_2, window_bounds = array<i64: 896, 128>}, {pipeline_mode = #tpu.pipeline_mode<synchronous>, transform_indices = @transform_3, window_bounds = array<i64: 1, 128>}, {pipeline_mode = #tpu.pipeline_mode<synchronous>, transform_indices = @transform_4, window_bounds = array<i64: 128, 256>}, {pipeline_mode = #tpu.pipeline_mode<synchronous>, transform_indices = @transform_5, window_bounds = array<i64: 1, 256>}, {pipeline_mode = #tpu.pipeline_mode<synchronous>, transform_indices = @transform_6, window_bounds = array<i64: 128, 128>}, {pipeline_mode = #tpu.pipeline_mode<synchronous>, transform_indices = @transform_7, window_bounds = array<i64: 1, 128>}, {pipeline_mode = #tpu.pipeline_mode<synchronous>, transform_indices = @transform_8, window_bounds = array<i64: 128, 896>}, {pipeline_mode = #tpu.pipeline_mode<synchronous>, transform_indices = @transform_9, window_bounds = array<i64: 1, 896>}, {transform_indices = @transform_10, window_bounds = array<i64: 8, 896>}, {transform_indices = @transform_11, window_bounds = array<i64: 8, 256>}]} {
    %c0 = arith.constant 0 : index
    %c0_0 = arith.constant 0 : index
    %0 = vector.load %arg1[%c0, %c0_0] : memref<8x896xbf16, #tpu.memory_space<vmem>>, vector<8x896xbf16>
    %c0_1 = arith.constant 0 : index
    %c0_2 = arith.constant 0 : index
    %1 = vector.load %arg2[%c0_1, %c0_2] : memref<8x128xf32, #tpu.memory_space<vmem>>, vector<8x128xf32>
    %c0_3 = arith.constant 0 : index
    %c0_4 = arith.constant 0 : index
    %2 = vector.load %arg3[%c0_3, %c0_4] : memref<896x128xbf16, #tpu.memory_space<vmem>>, vector<896x128xbf16>
    %cst = arith.constant dense<0.000000e+00> : vector<8x128xf32>
    %3 = tpu.matmul %0, %2, %cst {dimension_numbers = #tpu.dot_dimension_numbers<[1], [0], [0], [1], [0, 0, 1, 1], [], []>} : vector<8x896xbf16>, vector<896x128xbf16>, vector<8x128xf32> -> vector<8x128xf32>
    %c0_5 = arith.constant 0 : index
    %c0_6 = arith.constant 0 : index
    %4 = vector.load %arg4[%c0_5, %c0_6] : memref<1x128xf32, #tpu.memory_space<vmem>>, vector<1x128xf32>
    %5 = vector.broadcast %4 : vector<1x128xf32> to vector<8x128xf32>
    %6 = arith.addf %3, %5 : vector<8x128xf32>
    %cst_7 = arith.constant 0.000000e+00 : f32
    %7 = vector.broadcast %cst_7 : f32 to vector<8x128xf32>
    %8 = arith.maximumf %6, %7 : vector<8x128xf32>
    %9 = arith.truncf %8 : vector<8x128xf32> to vector<8x128xbf16>
    %c0_8 = arith.constant 0 : index
    %c0_9 = arith.constant 0 : index
    %10 = vector.load %arg5[%c0_8, %c0_9] : memref<128x256xbf16, #tpu.memory_space<vmem>>, vector<128x256xbf16>
    %cst_10 = arith.constant dense<0.000000e+00> : vector<8x256xf32>
    %11 = tpu.matmul %9, %10, %cst_10 {dimension_numbers = #tpu.dot_dimension_numbers<[1], [0], [0], [1], [0, 0, 1, 1], [], []>} : vector<8x128xbf16>, vector<128x256xbf16>, vector<8x256xf32> -> vector<8x256xf32>
    %c0_11 = arith.constant 0 : index
    %c0_12 = arith.constant 0 : index
    %12 = vector.load %arg6[%c0_11, %c0_12] : memref<1x256xf32, #tpu.memory_space<vmem>>, vector<1x256xf32>
    %13 = vector.broadcast %12 : vector<1x256xf32> to vector<8x256xf32>
    %14 = arith.addf %11, %13 : vector<8x256xf32>
    %15 = arith.truncf %14 : vector<8x256xf32> to vector<8x256xbf16>
    %c0_13 = arith.constant 0 : index
    %c0_14 = arith.constant 0 : index
    %16 = vector.load %arg12[%c0_13, %c0_14] : memref<8x256xbf16, #tpu.memory_space<vmem>>, vector<8x256xbf16>
    tpu.vector_store %arg12[%c0_13, %c0_14], %15 {strides = array<i32>} : memref<8x256xbf16, #tpu.memory_space<vmem>>, vector<8x256xbf16>,
    %17 = vector.extract_strided_slice %14 {offsets = [0, 0], sizes = [8, 128], strides = [1, 1]} : vector<8x256xf32> to vector<8x128xf32>
    %18 = vector.extract_strided_slice %14 {offsets = [0, 128], sizes = [8, 128], strides = [1, 1]} : vector<8x256xf32> to vector<8x128xf32>
    %cst_15 = arith.constant 5.000000e-01 : f32
    %19 = vector.broadcast %cst_15 : f32 to vector<8x128xf32>
    %20 = arith.mulf %19, %18 : vector<8x128xf32>
    %21 = math.exp %20 : vector<8x128xf32>
    %22 = arith.mulf %1, %21 : vector<8x128xf32>
    %23 = arith.addf %17, %22 : vector<8x128xf32>
    %24 = arith.truncf %23 : vector<8x128xf32> to vector<8x128xbf16>
    %c0_16 = arith.constant 0 : index
    %c0_17 = arith.constant 0 : index
    %25 = vector.load %arg7[%c0_16, %c0_17] : memref<128x128xbf16, #tpu.memory_space<vmem>>, vector<128x128xbf16>
    %cst_18 = arith.constant dense<0.000000e+00> : vector<8x128xf32>
    %26 = tpu.matmul %24, %25, %cst_18 {dimension_numbers = #tpu.dot_dimension_numbers<[1], [0], [0], [1], [0, 0, 1, 1], [], []>} : vector<8x128xbf16>, vector<128x128xbf16>, vector<8x128xf32> -> vector<8x128xf32>
    %c0_19 = arith.constant 0 : index
    %c0_20 = arith.constant 0 : index
    %27 = vector.load %arg8[%c0_19, %c0_20] : memref<1x128xf32, #tpu.memory_space<vmem>>, vector<1x128xf32>
    %28 = vector.broadcast %27 : vector<1x128xf32> to vector<8x128xf32>
    %29 = arith.addf %26, %28 : vector<8x128xf32>
    %cst_21 = arith.constant 0.000000e+00 : f32
    %30 = vector.broadcast %cst_21 : f32 to vector<8x128xf32>
    %31 = arith.maximumf %29, %30 : vector<8x128xf32>
    %32 = arith.truncf %31 : vector<8x128xf32> to vector<8x128xbf16>
    %c0_22 = arith.constant 0 : index
    %c0_23 = arith.constant 0 : index
    %33 = vector.load %arg9[%c0_22, %c0_23] : memref<128x896xbf16, #tpu.memory_space<vmem>>, vector<128x896xbf16>
    %cst_24 = arith.constant dense<0.000000e+00> : vector<8x896xf32>
    %34 = tpu.matmul %32, %33, %cst_24 {dimension_numbers = #tpu.dot_dimension_numbers<[1], [0], [0], [1], [0, 0, 1, 1], [], []>} : vector<8x128xbf16>, vector<128x896xbf16>, vector<8x896xf32> -> vector<8x896xf32>
    %c0_25 = arith.constant 0 : index
    %c0_26 = arith.constant 0 : index
    %35 = vector.load %arg10[%c0_25, %c0_26] : memref<1x896xf32, #tpu.memory_space<vmem>>, vector<1x896xf32>
    %36 = vector.broadcast %35 : vector<1x896xf32> to vector<8x896xf32>
    %37 = arith.addf %34, %36 : vector<8x896xf32>
    %cst_27 = arith.constant 5.000000e-01 : f32
    %38 = vector.broadcast %cst_27 : f32 to vector<8x896xf32>
    %39 = arith.mulf %38, %37 : vector<8x896xf32>
    %40 = math.tanh %39 : vector<8x896xf32>
    %cst_28 = arith.constant 5.000000e-01 : f32
    %41 = vector.broadcast %cst_28 : f32 to vector<8x896xf32>
    %42 = arith.mulf %41, %40 : vector<8x896xf32>
    %cst_29 = arith.constant 5.000000e-01 : f32
    %43 = vector.broadcast %cst_29 : f32 to vector<8x896xf32>
    %44 = arith.addf %42, %43 : vector<8x896xf32>
    %45 = arith.truncf %44 : vector<8x896xf32> to vector<8x896xbf16>
    %c0_30 = arith.constant 0 : index
    %c0_31 = arith.constant 0 : index
    %46 = vector.load %arg11[%c0_30, %c0_31] : memref<8x896xbf16, #tpu.memory_space<vmem>>, vector<8x896xbf16>
    tpu.vector_store %arg11[%c0_30, %c0_31], %45 {strides = array<i32>} : memref<8x896xbf16, #tpu.memory_space<vmem>>, vector<8x896xbf16>,
    return
  }
  func.func @transform_0(%arg0: i32) -> (i32, i32) {
    %c0_i32 = arith.constant 0 : i32
    %c0_i32_0 = arith.constant 0 : i32
    return %arg0, %c0_i32 : i32, i32
  }
  func.func @transform_1(%arg0: i32) -> (i32, i32) {
    %c0_i32 = arith.constant 0 : i32
    %c0_i32_0 = arith.constant 0 : i32
    return %arg0, %c0_i32 : i32, i32
  }
  func.func @transform_2(%arg0: i32) -> (i32, i32) {
    %c0_i32 = arith.constant 0 : i32
    %c0_i32_0 = arith.constant 0 : i32
    %c0_i32_1 = arith.constant 0 : i32
    return %c0_i32, %c0_i32_0 : i32, i32
  }
  func.func @transform_3(%arg0: i32) -> (i32, i32) {
    %c0_i32 = arith.constant 0 : i32
    %c0_i32_0 = arith.constant 0 : i32
    %c0_i32_1 = arith.constant 0 : i32
    return %c0_i32, %c0_i32_0 : i32, i32
  }
  func.func @transform_4(%arg0: i32) -> (i32, i32) {
    %c0_i32 = arith.constant 0 : i32
    %c0_i32_0 = arith.constant 0 : i32
    %c0_i32_1 = arith.constant 0 : i32
    return %c0_i32, %c0_i32_0 : i32, i32
  }
  func.func @transform_5(%arg0: i32) -> (i32, i32) {
    %c0_i32 = arith.constant 0 : i32
    %c0_i32_0 = arith.constant 0 : i32
    %c0_i32_1 = arith.constant 0 : i32
    return %c0_i32, %c0_i32_0 : i32, i32
  }
  func.func @transform_6(%arg0: i32) -> (i32, i32) {
    %c0_i32 = arith.constant 0 : i32
    %c0_i32_0 = arith.constant 0 : i32
    %c0_i32_1 = arith.constant 0 : i32
    return %c0_i32, %c0_i32_0 : i32, i32
  }
  func.func @transform_7(%arg0: i32) -> (i32, i32) {
    %c0_i32 = arith.constant 0 : i32
    %c0_i32_0 = arith.constant 0 : i32
    %c0_i32_1 = arith.constant 0 : i32
    return %c0_i32, %c0_i32_0 : i32, i32
  }
  func.func @transform_8(%arg0: i32) -> (i32, i32) {
    %c0_i32 = arith.constant 0 : i32
    %c0_i32_0 = arith.constant 0 : i32
    %c0_i32_1 = arith.constant 0 : i32
    return %c0_i32, %c0_i32_0 : i32, i32
  }
  func.func @transform_9(%arg0: i32) -> (i32, i32) {
    %c0_i32 = arith.constant 0 : i32
    %c0_i32_0 = arith.constant 0 : i32
    %c0_i32_1 = arith.constant 0 : i32
    return %c0_i32, %c0_i32_0 : i32, i32
  }
  func.func @transform_10(%arg0: i32) -> (i32, i32) {
    %c0_i32 = arith.constant 0 : i32
    %c0_i32_0 = arith.constant 0 : i32
    return %arg0, %c0_i32 : i32, i32
  }
  func.func @transform_11(%arg0: i32) -> (i32, i32) {
    %c0_i32 = arith.constant 0 : i32
    %c0_i32_0 = arith.constant 0 : i32
    return %arg0, %c0_i32 : i32, i32
  }
}

</mosaic_0001>

<bundles_post_ra>
// kernel: vae_forward.1
= control target key start
LH: loop header
LB: loop body
LE: loop exit
PB: predicated region body
PF: predicated region fallthrough
CT: control target
= control target key end

     0   :  { %17 = vsyncpa [#allocation3], 0  ;;  %s2445_s0 = inlined_call_operand.vmem [shape: bf16[8,896], index: 0, kind: input, shape index: {}]   ;;  %s2446_s1 = inlined_call_operand.vmem [shape: f32[8,128], index: 1, kind: input, shape index: {}]   ;;  %s2447_s2 = inlined_call_operand.hbm [shape: bf16[896,128], index: 2, kind: input, shape index: {}]   ;;  %s2448_s3 = inlined_call_operand.vmem [shape: f32[1,128], index: 3, kind: input, shape index: {}]   ;;  %s2449_s4 = inlined_call_operand.vmem [shape: bf16[128,256], index: 4, kind: input, shape index: {}]   ;;  %s2450_s5 = inlined_call_operand.vmem [shape: f32[1,256], index: 5, kind: input, shape index: {}]   ;;  %s2451_s6 = inlined_call_operand.hbm [shape: bf16[128,128], index: 6, kind: input, shape index: {}]   ;;  %s2452_s7 = inlined_call_operand.vmem [shape: f32[1,128], index: 7, kind: input, shape index: {}]   ;;  %s2453_s8 = inlined_call_operand.hbm [shape: bf16[128,896], index: 8, kind: input, shape index: {}]   ;;  %s2454_s9 = inlined_call_operand.vmem [shape: f32[1,896], index: 9, kind: input, shape index: {}]   ;;  %s2455_s10 = inlined_call_operand.hbm [shape: bf16[8,896], index: 10, kind: output, shape index: {0}]   ;;  %s2456_s11 = inlined_call_operand.vmem [shape: bf16[8,256], index: 11, kind: output, shape index: {1}]  }
   0x1   :  { %18 = vsyncpa [#allocation6], 0 }
   0x2   :  { %19 = vsyncpa [#allocation4], 0  ;;  %s2233_s17 = smov [#allocation5]   ;;  %s2234_s19 = smov [#allocation2]  }
   0x3   :  { %s47_s18 = sshll.u32 %s2233_s17, 4  ;;  %s29_s20 = sshll.u32 %s2234_s19, 4  ;;  %s48_s18 = int_to_ptr.vmem [resolvable:$true] %s47_s18  ;;  %s30_s20 = int_to_ptr.vmem [resolvable:$true] %s29_s20 }
   0x4   :  { %s2155_s21 = scalar_lea.vmem %s48_s18, 1024  ;;  %p2160_p1 = scmp.lt.s32.totalorder %s48_s18, %s48_s18 }
   0x5   :  { %p2156_p0 = scmp.ne.s32.totalorder %s48_s18, %s2155_s21  ;;  %p2161_p2 = scmp.lt.s32.totalorder %s2155_s21, %s2155_s21 }
   0x7   :  { %p2162_p3 = por %p2161_p2, %p2160_p1 }
   0x9   :  { %p2163_p4 = pnand %p2162_p3, %p2156_p0 }
   0xb   :  { %2166 = shalt.err (!%p2163_p4)
}
   0xc   :  { %s2235_s22 = smov 64   ;;  %s2236_s23 = smov 4  }
   0xd   :  { %53 = dma.hbm_to_vmem [thread:$0]  %s2451_s6, 1024, %s48_s18, [#allocation6], %s2235_s22, %s2235_s22, %s2236_s23  }
   0xe   :  { %s2175_s26 = scalar_lea.vmem %s30_s20, 7168  ;;  %p2180_p6 = scmp.lt.s32.totalorder %s30_s20, %s30_s20 }
   0xf   :  { %p2176_p5 = scmp.ne.s32.totalorder %s30_s20, %s2175_s26  ;;  %p2181_p7 = scmp.lt.s32.totalorder %s2175_s26, %s2175_s26 }
  0x11   :  { %p2182_p8 = por %p2181_p7, %p2180_p6 }
  0x13   :  { %p2183_p9 = pnand %p2182_p8, %p2176_p5 }
  0x15   :  { %2186 = shalt.err (!%p2183_p9)
}
  0x16   :  { %35 = dma.hbm_to_vmem [thread:$0]  %s2447_s2, 7168, %s30_s20, [#allocation3], %s2235_s22, %s2235_s22, %s2236_s23  }
  0x17   :  { %s2237_s29 = smov [#allocation7]  }
  0x18   :  { %s61_s30 = sshll.u32 %s2237_s29, 4  ;;  %s62_s30 = int_to_ptr.vmem [resolvable:$true] %s61_s30 }
  0x19   :  { %s2195_s12 = scalar_lea.vmem %s62_s30, 7168  ;;  %p2200_p11 = scmp.lt.s32.totalorder %s62_s30, %s62_s30 }
  0x1a   :  { %p2196_p10 = scmp.ne.s32.totalorder %s62_s30, %s2195_s12  ;;  %p2201_p12 = scmp.lt.s32.totalorder %s2195_s12, %s2195_s12 }
  0x1c   :  { %p2202_p13 = por %p2201_p12, %p2200_p11 }
  0x1e   :  { %p2203_p0 = pnand %p2202_p13, %p2196_p10 }
  0x20   :  { %2206 = shalt.err (!%p2203_p0)
}
  0x21   :  { %s2238_s6 = smov 448   ;;  %s2239_s13 = smov 28  }
  0x22   :  { %67 = dma.hbm_to_vmem [thread:$0]  %s2453_s8, 7168, %s62_s30, [#allocation6], %s2238_s6, %s2238_s6, %s2239_s13  }
  0x23   :  { %2227 = dma.done.wait [#allocation3], 7168  }
  0x24   :  { %2228 = vsyncadd [#allocation3], 4294960128 }
  0x25   :  { %2229 = dma.done.wait [#allocation6], 8192  }
  0x26   :  { %2230 = vsyncadd [#allocation6], 4294959104  ;;  %v1956_v0 = vld [vmem:[#allocation2 + $0x78] sm:$0xff]   ;;  %v1960_v4 = vld [vmem:[#allocation2 + $0x70] sm:$0xff]   ;;  %v2240_v39 = vmov 0.0   ;;  %vm2241_vm0 = vmmov 0  }
  0x27   :  { %v1957_v1 = vld [vmem:[#allocation2 + $0xf8] sm:$0xff]   ;;  %1792 = vmatprep.subr.bf16.mxu0 %v1956_v0  ;;  %v1961_v5 = vld [vmem:[#allocation2 + $0xf0] sm:$0xff]   ;;  %v1964_v8 = vld [vmem:[#allocation2 + $0x68] sm:$0xff]  }
  0x28   :  { %v1958_v2 = vld [vmem:[#allocation2 + $0x38] sm:$0xff]   ;;  %1814 = vmatprep.subr.bf16.mxu1 %v1957_v1  ;;  %v1962_v6 = vld [vmem:[#allocation2 + $0x30] sm:$0xff]   ;;  %v1965_v9 = vld [vmem:[#allocation2 + $0xe8] sm:$0xff]  }
  0x29   :  { %v1959_v3 = vld [vmem:[#allocation2 + $0xb8] sm:$0xff]   ;;  %1793 = vmatpush3.bf16.msra.mxu0 %v1958_v2  ;;  %v1963_v7 = vld [vmem:[#allocation2 + $0xb0] sm:$0xff]   ;;  %v1966_v10 = vld [vmem:[#allocation2 + $0x28] sm:$0xff]  }
  0x2a   :  { %1815 = vmatpush3.bf16.msra.mxu1 %v1959_v3  ;;  %1794 = vmatprep.subr.bf16.mxu0 %v1960_v4  ;;  %v1967_v11 = vld [vmem:[#allocation2 + $0xa8] sm:$0xff]   ;;  %v1968_v12 = vld [vmem:[#allocation2 + $0x60] sm:$0xff]   ;;  %v1972_v16 = vld [vmem:[#allocation2 + $0x58] sm:$0xff]  }
  0x2b   :  { %1816 = vmatprep.subr.bf16.mxu1 %v1961_v5  ;;  %v1969_v13 = vld [vmem:[#allocation2 + $0xe0] sm:$0xff]   ;;  %v1973_v17 = vld [vmem:[#allocation2 + $0xd8] sm:$0xff]   ;;  %v1976_v20 = vld [vmem:[#allocation2 + $0x50] sm:$0xff]  }
  0x2c   :  { %v1970_v14 = vld [vmem:[#allocation2 + $0x20] sm:$0xff]   ;;  %v1974_v18 = vld [vmem:[#allocation2 + $0x18] sm:$0xff]   ;;  %v1977_v21 = vld [vmem:[#allocation2 + $0xd0] sm:$0xff]  }
  0x2d   :  { %1795 = vmatpush3.bf16.msra.mxu0 %v1962_v6  ;;  %v1971_v15 = vld [vmem:[#allocation2 + $0xa0] sm:$0xff]   ;;  %v1975_v19 = vld [vmem:[#allocation2 + $0x98] sm:$0xff]   ;;  %v1978_v22 = vld [vmem:[#allocation2 + $0x10] sm:$0xff]  }
  0x2e   :  { %1817 = vmatpush3.bf16.msra.mxu1 %v1963_v7  ;;  %1796 = vmatprep.subr.bf16.mxu0 %v1964_v8  ;;  %v1979_v23 = vld [vmem:[#allocation2 + $0x90] sm:$0xff]   ;;  %v1980_v24 = vld [vmem:[#allocation2 + $0x48] sm:$0xff]   ;;  %v1984_v28 = vld [vmem:[#allocation2 + $0x40] sm:$0xff]  }
  0x2f   :  { %1818 = vmatprep.subr.bf16.mxu1 %v1965_v9  ;;  %v1981_v25 = vld [vmem:[#allocation2 + $0xc8] sm:$0xff]   ;;  %v1985_v29 = vld [vmem:[#allocation2 + $0xc0] sm:$0xff]   ;;  %v1992_v38 = vld [vmem:[#allocation2 + $0x178] sm:$0xff]  }
  0x30   :  { %v1982_v26 = vld [vmem:[#allocation2 + $0x8] sm:$0xff]   ;;  %v1986_v30 = vld [vmem:[#allocation2] sm:$0xff]   ;;  %v1993_v40 = vld [vmem:[#allocation2 + $0x138] sm:$0xff]  }
  0x31   :  { %1797 = vmatpush3.bf16.msra.mxu0 %v1966_v10  ;;  %v1983_v27 = vld [vmem:[#allocation2 + $0x88] sm:$0xff]   ;;  %v1987_v31 = vld [vmem:[#allocation2 + $0x80] sm:$0xff]   ;;  %v1994_v41 = vld [vmem:[#allocation2 + $0x1b8] sm:$0xff]  }
  0x32   :  { %1819 = vmatpush3.bf16.msra.mxu1 %v1967_v11  ;;  %1798 = vmatprep.subr.bf16.mxu0 %v1968_v12  ;;  %v80_v32 = vld [vmem:[%s2445_s0] sm:$0xff]  ;;  %v81_v33 = vld [vmem:[%s2445_s0 + $0x8] sm:$0xff]  ;;  %v1995_v42 = vld [vmem:[#allocation2 + $0x170] sm:$0xff]  }
  0x33   :  { %1820 = vmatprep.subr.bf16.mxu1 %v1969_v13  ;;  %v1638_v34 = vcombine.low %v80_v32, %v80_v32  ;;  %v1639_v35 = vcombine.high %v80_v32, %v80_v32  ;;  %v1640_v36 = vcombine.low %v81_v33, %v81_v33  ;;  %v1641_v37 = vcombine.high %v81_v33, %v81_v33  ;;  %v1996_v43 = vld [vmem:[#allocation2 + $0x130] sm:$0xff]   ;;  %v1998_v45 = vld [vmem:[#allocation2 + $0x168] sm:$0xff]   ;;  %v2001_v48 = vld [vmem:[#allocation2 + $0x160] sm:$0xff]  }
  0x34   :  { %v1997_v44 = vld [vmem:[#allocation2 + $0x1b0] sm:$0xff]   ;;  %v1999_v46 = vld [vmem:[#allocation2 + $0x128] sm:$0xff]   ;;  %v2002_v49 = vld [vmem:[#allocation2 + $0x120] sm:$0xff]  }
  0x35   :  { %1799 = vmatpush3.bf16.msra.mxu0 %v1970_v14  ;;  %597 = vmatprep.mubr.bf16.mxu0 %v1639_v35  ;;  %v2000_v47 = vld [vmem:[#allocation2 + $0x1a8] sm:$0xff]   ;;  %v2003_v50 = vld [vmem:[#allocation2 + $0x1a0] sm:$0xff]   ;;  %v2004_v51 = vld [vmem:[#allocation2 + $0x158] sm:$0xff]  }
  0x36   :  { %1821 = vmatpush3.bf16.msra.mxu1 %v1971_v15  ;;  %1800 = vmatprep.subr.bf16.mxu0 %v1972_v16  ;;  %v2005_v52 = vld [vmem:[#allocation2 + $0x118] sm:$0xff]   ;;  %v2007_v54 = vld [vmem:[#allocation2 + $0x150] sm:$0xff]   ;;  %v2010_v57 = vld [vmem:[#allocation2 + $0x148] sm:$0xff]  }
  0x37   :  { %1822 = vmatprep.subr.bf16.mxu1 %v1973_v17  ;;  %637 = vmatprep.mubr.bf16.mxu1 %v1641_v37  ;;  %v2006_v53 = vld [vmem:[#allocation2 + $0x198] sm:$0xff]   ;;  %v2008_v55 = vld [vmem:[#allocation2 + $0x110] sm:$0xff]   ;;  %v2011_v58 = vld [vmem:[#allocation2 + $0x108] sm:$0xff]  }
  0x38   :  { %v2009_v56 = vld [vmem:[#allocation2 + $0x190] sm:$0xff]   ;;  %v2012_v59 = vld [vmem:[#allocation2 + $0x188] sm:$0xff]   ;;  %v2013_v61 = vld [vmem:[#allocation2 + $0x140] sm:$0xff]  }
  0x39   :  { %1801 = vmatpush3.bf16.msra.mxu0 %v1974_v18  ;;  %v82_v60 = vld [vmem:[%s2445_s0 + $0x10] sm:$0xff]  ;;  %v2014_v63 = vld [vmem:[#allocation2 + $0x100] sm:$0xff]   ;;  %v2018_v1 = vld [vmem:[%s2445_s0 + $0x18] ss:$0 sps:$4 sm:$0xff]  }
  0x3a   :  { %1823 = vmatpush3.bf16.msra.mxu1 %v1975_v19  ;;  %1802 = vmatprep.subr.bf16.mxu0 %v1976_v20  ;;  %v1643_v62 = vcombine.high %v82_v60, %v82_v60  ;;  %v2015_v0 = vld [vmem:[#allocation2 + $0x180] sm:$0xff]   ;;  %v1642_v2 = vcombine.low %v82_v60, %v82_v60  ;;  %v2019_v3 = vld [vmem:[%s2449_s4 + $0x70] ss:$8 sps:$4 sm:$0xff]   ;;  %v2021_v4 = vld [vmem:[%s2449_s4 + $0x74] ss:$8 sps:$4 sm:$0xff]   ;;  %v2242_v19 = vmov 0  }
  0x3b   :  { %1824 = vmatprep.subr.bf16.mxu1 %v1977_v21  ;;  %v2024_v5 = vld [vmem:[%s2449_s4 + $0x64] ss:$8 sps:$4 sm:$0xff]   ;;  %v2022_v6 = vld [vmem:[%s2449_s4 + $0x60] ss:$8 sps:$4 sm:$0xff]   ;;  %v2027_v7 = vld [vmem:[%s2449_s4 + $0x54] ss:$8 sps:$4 sm:$0xff]  }
  0x3c   :  { %v2025_v8 = vld [vmem:[%s2449_s4 + $0x50] ss:$8 sps:$4 sm:$0xff]   ;;  %v2030_v9 = vld [vmem:[%s2449_s4 + $0x44] ss:$8 sps:$4 sm:$0xff]   ;;  %v2028_v10 = vld [vmem:[%s2449_s4 + $0x40] ss:$8 sps:$4 sm:$0xff]  }
  0x3d   :  { %1803 = vmatpush3.bf16.msra.mxu0 %v1978_v22  ;;  %v2033_v11 = vld [vmem:[%s2449_s4 + $0x34] ss:$8 sps:$4 sm:$0xff]   ;;  %v2031_v12 = vld [vmem:[%s2449_s4 + $0x30] ss:$8 sps:$4 sm:$0xff]   ;;  %v2036_v13 = vld [vmem:[%s2449_s4 + $0x24] ss:$8 sps:$4 sm:$0xff]  }
  0x3e   :  { %1825 = vmatpush3.bf16.msra.mxu1 %v1979_v23  ;;  %1804 = vmatprep.subr.bf16.mxu0 %v1980_v24  ;;  %v2034_v14 = vld [vmem:[%s2449_s4 + $0x20] ss:$8 sps:$4 sm:$0xff]   ;;  %v2039_v15 = vld [vmem:[%s2449_s4 + $0x14] ss:$8 sps:$4 sm:$0xff]   ;;  %v2037_v16 = vld [vmem:[%s2449_s4 + $0x10] ss:$8 sps:$4 sm:$0xff]  }
  0x3f   :  { %1826 = vmatprep.subr.bf16.mxu1 %v1981_v25  ;;  %v2042_v17 = vld [vmem:[%s2449_s4 + $0x4] ss:$8 sps:$4 sm:$0xff]   ;;  %v2040_v18 = vld [vmem:[%s2449_s4] ss:$8 sps:$4 sm:$0xff]   ;;  %v2043_v20 = vld [vmem:[#allocation5 + $0x38] sm:$0xff]  }
  0x40   :  { %v2065_v60 = vld [vmem:[#allocation7 + $0x11c] ss:$28 sps:$4 sm:$0xff]  }
  0x41   :  { %1805 = vmatpush3.bf16.msra.mxu0 %v1982_v26 }
  0x42   :  { %1827 = vmatpush3.bf16.msra.mxu1 %v1983_v27  ;;  %1806 = vmatprep.subr.bf16.mxu0 %v1984_v28 }
  0x43   :  { %1828 = vmatprep.subr.bf16.mxu1 %v1985_v29 }
  0x45   :  { %1807 = vmatpush3.bf16.msra.mxu0 %v1986_v30  ;;  %v1637_v30 = vld [vmem:[%s2448_s3] ss:$0 sm:$0xff] }
  0x46   :  { %1829 = vmatpush3.bf16.msra.mxu1 %v1987_v31  ;;  %1836 = vmatprep.subr.bf16.mxu0 %v1992_v38 }
  0x47   :  { %1885 = vmatprep.subr.bf16.mxu1 %v2240_v39 }
  0x48   :  { %598 = vmatmul.mubr.bf16.vlgmr.msra.gmra.mxu0 %v1638_v34 }
  0x49   :  { %638 = vmatmul.mubr.bf16.vlgmr.msra.gmra.mxu1 %v1640_v36  ;;  %1837 = vmatpush3.bf16.msra.mxu0 %v1993_v40 }
  0x4a   :  { %1886 = vmatpush3.bf16.msra.mxu1 %v1994_v41  ;;  %1838 = vmatprep.subr.bf16.mxu0 %v1995_v42 }
  0x4b   :  { %1887 = vmatprep.subr.bf16.mxu1 %v2240_v39  ;;  %1901 = vmatprep.mubr.msk.bf16.mxu1 %vm2241_vm0, %v2240_v39 }
  0x4c   :  { %677 = vmatprep.mubr.bf16.mxu0 %v1643_v62  ;;  %v2071_v62 = vld [vmem:[#allocation7 + $0xe4] ss:$28 sps:$4 sm:$0xff]  }
  0x4d   :  { %1839 = vmatpush3.bf16.msra.mxu0 %v1996_v43 }
  0x4e   :  { %1888 = vmatpush3.bf16.msra.mxu1 %v1997_v44  ;;  %1840 = vmatprep.subr.bf16.mxu0 %v1998_v45 }
  0x4f   :  { %1889 = vmatprep.subr.bf16.mxu1 %v2240_v39 }
  0x51   :  { %1841 = vmatpush3.bf16.msra.mxu0 %v1999_v46 }
  0x52   :  { %1890 = vmatpush3.bf16.msra.mxu1 %v2000_v47  ;;  %1842 = vmatprep.subr.bf16.mxu0 %v2001_v48  ;;  %v2044_v48 = vld [vmem:[#allocation5 + $0x30] sm:$0xff]  }
  0x53   :  { %1891 = vmatprep.subr.bf16.mxu1 %v2240_v39 }
  0x55   :  { %1843 = vmatpush3.bf16.msra.mxu0 %v2002_v49  ;;  %v2045_v49 = vld [vmem:[#allocation5 + $0x28] sm:$0xff]  }
  0x56   :  { %1892 = vmatpush3.bf16.msra.mxu1 %v2003_v50  ;;  %1844 = vmatprep.subr.bf16.mxu0 %v2004_v51  ;;  %v2046_v50 = vld [vmem:[#allocation5 + $0x20] sm:$0xff]   ;;  %v2047_v51 = vld [vmem:[#allocation5 + $0x18] sm:$0xff]  }
  0x57   :  { %1893 = vmatprep.subr.bf16.mxu1 %v2240_v39 }
  0x59   :  { %1845 = vmatpush3.bf16.msra.mxu0 %v2005_v52  ;;  %v2048_v52 = vld [vmem:[#allocation5 + $0x10] sm:$0xff]  }
  0x5a   :  { %1894 = vmatpush3.bf16.msra.mxu1 %v2006_v53  ;;  %1846 = vmatprep.subr.bf16.mxu0 %v2007_v54  ;;  %v2049_v53 = vld [vmem:[#allocation5 + $0x8] sm:$0xff]   ;;  %v2050_v54 = vld [vmem:[#allocation5] sm:$0xff]  }
  0x5b   :  { %1895 = vmatprep.subr.bf16.mxu1 %v2240_v39 }
  0x5d   :  { %1847 = vmatpush3.bf16.msra.mxu0 %v2008_v55  ;;  %v2051_v55 = vld [vmem:[#allocation7 + $0x188] ss:$28 sps:$4 sm:$0xff]  }
  0x5e   :  { %1896 = vmatpush3.bf16.msra.mxu1 %v2009_v56  ;;  %1848 = vmatprep.subr.bf16.mxu0 %v2010_v57  ;;  %v2053_v56 = vld [vmem:[#allocation7 + $0x18c] ss:$28 sps:$4 sm:$0xff]   ;;  %v2056_v57 = vld [vmem:[#allocation7 + $0x194] ss:$28 sps:$4 sm:$0xff]  }
  0x5f   :  { %1897 = vmatprep.subr.bf16.mxu1 %v2240_v39 }
  0x61   :  { %1849 = vmatpush3.bf16.msra.mxu0 %v2011_v58  ;;  %v2059_v58 = vld [vmem:[#allocation7 + $0x154] ss:$28 sps:$4 sm:$0xff]  }
  0x62   :  { %1898 = vmatpush3.bf16.msra.mxu1 %v2012_v59  ;;  %1850 = vmatprep.subr.bf16.mxu0 %v2013_v61  ;;  %v2057_v59 = vld [vmem:[#allocation7 + $0x150] ss:$28 sps:$4 sm:$0xff]   ;;  %v2063_v61 = vld [vmem:[#allocation7 + $0x118] ss:$28 sps:$4 sm:$0xff]  }
  0x63   :  { %1899 = vmatprep.subr.bf16.mxu1 %v2240_v39 }
  0x65   :  { %1851 = vmatpush3.bf16.msra.mxu0 %v2014_v63  ;;  %v2069_v63 = vld [vmem:[#allocation7 + $0xe0] ss:$28 sps:$4 sm:$0xff]  }
  0x66   :  { %1900 = vmatpush3.bf16.msra.mxu1 %v2015_v0  ;;  %835 = vmatprep.subr.bf16.mxu0 %v2021_v4  ;;  %v2077_v0 = vld [vmem:[#allocation7 + $0xac] ss:$28 sps:$4 sm:$0xff]   ;;  %v2089_v4 = vld [vmem:[#allocation7 + $0x3c] ss:$28 sps:$4 sm:$0xff]  }
  0x67   :  { %1905 = vmatprep.subr.bf16.mxu1 %v2240_v39 }
  0x68   :  { %678 = vmatmul.mubr.bf16.vlgmr.msra.gmra.mxu0 %v1642_v2  ;;  %v2083_v2 = vld [vmem:[#allocation7 + $0x74] ss:$28 sps:$4 sm:$0xff]  }
  0x69   :  { %1902 = vmatmul.mubr.bf16.vlgmr.msra.gmra.mxu1 %v2018_v1  ;;  %836 = vmatpush1.bf16.msra.mxu0 %v2019_v3  ;;  %v2075_v1 = vld [vmem:[#allocation7 + $0xa8] ss:$28 sps:$4 sm:$0xff]   ;;  %v2081_v3 = vld [vmem:[#allocation7 + $0x70] ss:$28 sps:$4 sm:$0xff]  }
  0x6a   :  { %1921 = vmatprep.mubr.msk.bf16.mxu1 %vm2241_vm0, %v2240_v39  ;;  %837 = vmatprep.subr.bf16.mxu0 %v2024_v5  ;;  %v2087_v5 = vld [vmem:[#allocation7 + $0x38] ss:$28 sps:$4 sm:$0xff]  }
  0x6b   :  { %867 = vmatprep.mubr.bf16.mxu0 %v2242_v19  ;;  %1906 = vmatpush3.bf16.msra.mxu1 %v2043_v20 }
  0x6c   :  { %1907 = vmatprep.subr.bf16.mxu1 %v2240_v39 }
  0x6d   :  { %838 = vmatpush1.bf16.msra.mxu0 %v2022_v6  ;;  %v745_v6 = vlaneseq }
  0x6e   :  { %839 = vmatprep.subr.bf16.mxu0 %v2027_v7 }
  0x6f   :  { %1908 = vmatpush3.bf16.msra.mxu1 %v2044_v48  ;;  %v2398_v7 = vshrl.u32 %v745_v6, 7  ;;  %v2122_v6 = vld [vmem:[#allocation7 + $0x88] ss:$28 sps:$4 sm:$0xff]  }
  0x70   :  { %1909 = vmatprep.subr.bf16.mxu1 %v2240_v39 }
  0x71   :  { %840 = vmatpush1.bf16.msra.mxu0 %v2025_v8  ;;  %v747_v8 = vsub.s32 0, %v2398_v7 }
  0x72   :  { %841 = vmatprep.subr.bf16.mxu0 %v2030_v9  ;;  %v751_v9 = vsub.s32 1, %v2398_v7 }
  0x73   :  { %1910 = vmatpush3.bf16.msra.mxu1 %v2045_v49 }
  0x74   :  { %1911 = vmatprep.subr.bf16.mxu1 %v2240_v39 }
  0x75   :  { %842 = vmatpush1.bf16.msra.mxu0 %v2028_v10  ;;  %v743_v10 = vld [vmem:[%s2450_s5] sm:$0x3] }
  0x76   :  { %843 = vmatprep.subr.bf16.mxu0 %v2033_v11  ;;  %v748_v11 = vrot.slane %v743_v10, %v747_v8 }
  0x77   :  { %1912 = vmatpush3.bf16.msra.mxu1 %v2046_v50 }
  0x78   :  { %1913 = vmatprep.subr.bf16.mxu1 %v2240_v39 }
  0x79   :  { %844 = vmatpush1.bf16.msra.mxu0 %v2031_v12  ;;  %v752_v12 = vrot.slane %v743_v10, %v751_v9  ;;  %v2125_v10 = vld [vmem:[#allocation7 + $0x4c] ss:$28 sps:$4 sm:$0xff]  }
  0x7a   :  { %845 = vmatprep.subr.bf16.mxu0 %v2036_v13 }
  0x7b   :  { %1914 = vmatpush3.bf16.msra.mxu1 %v2047_v51 }
  0x7c   :  { %1915 = vmatprep.subr.bf16.mxu1 %v2240_v39 }
  0x7d   :  { %846 = vmatpush1.bf16.msra.mxu0 %v2034_v14 }
  0x7e   :  { %847 = vmatprep.subr.bf16.mxu0 %v2039_v15 }
  0x7f   :  { %1916 = vmatpush3.bf16.msra.mxu1 %v2048_v52 }
  0x80   :  { %1917 = vmatprep.subr.bf16.mxu1 %v2240_v39 }
  0x81   :  { %848 = vmatpush1.bf16.msra.mxu0 %v2037_v16 }
  0x82   :  { %849 = vmatprep.subr.bf16.mxu0 %v2042_v17 }
  0x83   :  { %1918 = vmatpush3.bf16.msra.mxu1 %v2049_v53  ;;  %v2099_v53 = vld [vmem:[#allocation7 + $0x198] ss:$28 sps:$4 sm:$0xff]  }
  0x84   :  { %1919 = vmatprep.subr.bf16.mxu1 %v2240_v39 }
  0x85   :  { %850 = vmatpush1.bf16.msra.mxu0 %v2040_v18 }
  0x86   :  { %1393 = vmatprep.subr.bf16.mxu0 %v2053_v56  ;;  %v2105_v56 = vld [vmem:[#allocation7 + $0x164] ss:$28 sps:$4 sm:$0xff]  }
  0x87   :  { %1920 = vmatpush3.bf16.msra.mxu1 %v2050_v54  ;;  %v2102_v54 = vld [vmem:[#allocation7 + $0x1a0] ss:$28 sps:$4 sm:$0xff]  }
  0x88   :  { %1434 = vmatprep.subr.bf16.mxu1 %v2056_v57 }
 0x108   :  { %v1808_v21 = vpop.f32.mrf.mxu0 }
 0x109   :  { %v1830_v22 = vpop.f32.mrf.mxu1 }
 0x10a   :  { %v1809_v23 = vpop.f32.mrf.mxu0 }
 0x10b   :  { %v1831_v24 = vpop.f32.mrf.mxu1  ;;  %v1810_v29 = vadd.f32 %v1809_v23, %v1808_v21  ;;  %v84_v23 = vld [vmem:[%s2446_s1] sm:$0xff] }
 0x10c   :  { %v1811_v25 = vpop.f32.mrf.mxu0  ;;  %v1832_v32 = vadd.f32 %v1831_v24, %v1830_v22 }
 0x10d   :  { %v1833_v26 = vpop.f32.mrf.mxu1  ;;  %v600_v31 = vadd.f32 %v1810_v29, %v1637_v30  ;;  %v2062_v29 = vld [vmem:[#allocation7 + $0x15c] ss:$28 sps:$4 sm:$0xff]  }
 0x10e   :  { %v1812_v27 = vpop.f32.mrf.mxu0  ;;  %v2060_v30 = vld [vmem:[#allocation7 + $0x158] ss:$28 sps:$4 sm:$0xff]  }
 0x10f   :  { %v1834_v28 = vpop.f32.mrf.mxu1  ;;  %v640_v36 = vadd.f32 %v1832_v32, %v600_v31  ;;  %v2054_v27 = vld [vmem:[#allocation7 + $0x190] ss:$28 sps:$4 sm:$0xff]   ;;  %v2068_v31 = vld [vmem:[#allocation7 + $0x124] ss:$28 sps:$4 sm:$0xff]  }
 0x110   :  { %v2066_v32 = vld [vmem:[#allocation7 + $0x120] ss:$28 sps:$4 sm:$0xff]  }
 0x128   :  { %v1852_v33 = vpop.f32.mrf.mxu0 }
 0x129   :  { %v719_v34 = vpop.f32.mrf.mxu1 }
 0x12a   :  { %v1853_v35 = vpop.f32.mrf.mxu0 }
 0x12b   :  { %v1854_v37 = vadd.f32 %v1853_v35, %v1852_v33  ;;  %v1903_v38 = vpop.f32.mrf.mxu1  ;;  %v2074_v33 = vld [vmem:[#allocation7 + $0xec] ss:$28 sps:$4 sm:$0xff]   ;;  %v2080_v35 = vld [vmem:[#allocation7 + $0xb4] ss:$28 sps:$4 sm:$0xff]  }
 0x12c   :  { %v1855_v40 = vpop.f32.mrf.mxu0  ;;  %v2084_v38 = vld [vmem:[#allocation7 + $0x78] ss:$28 sps:$4 sm:$0xff]  }
 0x12d   :  { %v680_v41 = vadd.f32 %v1854_v37, %v640_v36  ;;  %v722_v42 = vpop.f32.mrf.mxu1  ;;  %v2078_v36 = vld [vmem:[#allocation7 + $0xb0] ss:$28 sps:$4 sm:$0xff]   ;;  %v2086_v37 = vld [vmem:[#allocation7 + $0x7c] ss:$28 sps:$4 sm:$0xff]   ;;  %v2092_v40 = vld [vmem:[#allocation7 + $0x44] ss:$28 sps:$4 sm:$0xff]  }
 0x12e   :  { %v1856_v43 = vpop.f32.mrf.mxu0  ;;  %v2095_v42 = vld [vmem:[#allocation7 + $0x4] ss:$28 sps:$4 sm:$0xff]  }
 0x12f   :  { %v720_v44 = vadd.f32 %v719_v34, %v680_v41  ;;  %v1904_v45 = vpop.f32.mrf.mxu1  ;;  %v2072_v34 = vld [vmem:[#allocation7 + $0xe8] ss:$28 sps:$4 sm:$0xff]   ;;  %v2090_v41 = vld [vmem:[#allocation7 + $0x40] ss:$28 sps:$4 sm:$0xff]  }
 0x130   :  { %v2098_v43 = vld [vmem:[#allocation7 + $0xc] ss:$28 sps:$4 sm:$0xff]  }
 0x131   :  { %v725_v46 = vmax.f32 %v720_v44, 0.0  ;;  %v2093_v44 = vld [vmem:[#allocation7] ss:$28 sps:$4 sm:$0xff]   ;;  %v2096_v45 = vld [vmem:[#allocation7 + $0x8] ss:$28 sps:$4 sm:$0xff]  }
 0x133   :  { %v726_v47 = vpack.c.bf16 %v725_v46, %v725_v46  ;;  %v2101_v46 = vld [vmem:[#allocation7 + $0x19c] ss:$28 sps:$4 sm:$0xff]  }
 0x135   :  { %868 = vmatmul.mubr.bf16.vlgmr.msra.gmra.mxu0 %v726_v47  ;;  %v1718_v47 = vld [vmem:[%s2452_s7] ss:$0 sm:$0xff] }
 0x136   :  { %1425 = vmatprep.mubr.bf16.mxu0 %v2242_v19  ;;  %1394 = vmatpush1.bf16.msra.mxu0 %v2051_v55 }
 0x137   :  { %1395 = vmatprep.subr.bf16.mxu0 %v2059_v58  ;;  %v2103_v58 = vld [vmem:[#allocation7 + $0x160] ss:$28 sps:$4 sm:$0xff]  }
 0x13a   :  { %1396 = vmatpush1.bf16.msra.mxu0 %v2057_v59  ;;  %v2106_v59 = vld [vmem:[#allocation7 + $0x168] ss:$28 sps:$4 sm:$0xff]  }
 0x13b   :  { %1397 = vmatprep.subr.bf16.mxu0 %v2065_v60  ;;  %v2109_v60 = vld [vmem:[#allocation7 + $0x12c] ss:$28 sps:$4 sm:$0xff]  }
 0x13e   :  { %1398 = vmatpush1.bf16.msra.mxu0 %v2063_v61  ;;  %v2107_v61 = vld [vmem:[#allocation7 + $0x128] ss:$28 sps:$4 sm:$0xff]  }
 0x13f   :  { %1399 = vmatprep.subr.bf16.mxu0 %v2071_v62  ;;  %v2110_v62 = vld [vmem:[#allocation7 + $0x130] ss:$28 sps:$4 sm:$0xff]  }
 0x142   :  { %1400 = vmatpush1.bf16.msra.mxu0 %v2069_v63  ;;  %v2113_v63 = vld [vmem:[#allocation7 + $0xf4] ss:$28 sps:$4 sm:$0xff]  }
 0x143   :  { %1401 = vmatprep.subr.bf16.mxu0 %v2077_v0  ;;  %v2111_v0 = vld [vmem:[#allocation7 + $0xf0] ss:$28 sps:$4 sm:$0xff]  }
 0x146   :  { %1402 = vmatpush1.bf16.msra.mxu0 %v2075_v1  ;;  %v2114_v1 = vld [vmem:[#allocation7 + $0xf8] ss:$28 sps:$4 sm:$0xff]  }
 0x147   :  { %1403 = vmatprep.subr.bf16.mxu0 %v2083_v2  ;;  %v2117_v2 = vld [vmem:[#allocation7 + $0xbc] ss:$28 sps:$4 sm:$0xff]  }
 0x14a   :  { %1404 = vmatpush1.bf16.msra.mxu0 %v2081_v3  ;;  %v2118_v3 = vld [vmem:[#allocation7 + $0xc0] ss:$28 sps:$4 sm:$0xff]  }
 0x14b   :  { %1405 = vmatprep.subr.bf16.mxu0 %v2089_v4  ;;  %v2121_v4 = vld [vmem:[#allocation7 + $0x84] ss:$28 sps:$4 sm:$0xff]  }
 0x14e   :  { %1406 = vmatpush1.bf16.msra.mxu0 %v2087_v5  ;;  %v2119_v5 = vld [vmem:[#allocation7 + $0x80] ss:$28 sps:$4 sm:$0xff]  }
 0x14f   :  { %1407 = vmatprep.subr.bf16.mxu0 %v2095_v42 }
 0x152   :  { %1408 = vmatpush1.bf16.msra.mxu0 %v2093_v44 }
 0x153   :  { %1475 = vmatprep.subr.bf16.mxu0 %v2101_v46 }
 0x1f5   :  { %v869_v13 = vpop.f32.mrf.mxu0 }
 0x1f6   :  { %v870_v15 = vadd.f32 %v869_v13, %v748_v11  ;;  %v2123_v11 = vld [vmem:[#allocation7 + $0x48] ss:$28 sps:$4 sm:$0xff]   ;;  %v2129_v13 = vld [vmem:[#allocation7 + $0x14] ss:$28 sps:$4 sm:$0xff]  }
 0x1f7   :  { %v871_v14 = vpop.f32.mrf.mxu0 }
 0x1f8   :  { %v872_v16 = vadd.f32 %v871_v14, %v752_v12  ;;  %v2126_v12 = vld [vmem:[#allocation7 + $0x50] ss:$28 sps:$4 sm:$0xff]  }
 0x1f9   :  { %v873_v17 = vpop.f32.mrf.mxu0  ;;  %v2127_v14 = vld [vmem:[#allocation7 + $0x10] ss:$28 sps:$4 sm:$0xff]  }
 0x1fa   :  { %v1787_v18 = vpack.c.bf16 %v872_v16, %v870_v15  ;;  %v885_v20 = vmul.f32 0.5, %v872_v16  ;;  %v1080_v16 = vsub.s32 2, %v2398_v7  ;;  %v1068_v17 = vld [vmem:[%s2454_s9] sm:$0xff]  ;;  %s2243_s9 = smov [#allocation8]  }
 0x1fb   :  { %v874_v21 = vpop.f32.mrf.mxu0  ;;  %s1623_s2 = sshll.u32 %s2243_s9, 4  ;;  %s1624_s2 = int_to_ptr.vmem [resolvable:$true] %s1623_s2 }
 0x1fc   :  { %884 = vst [vmem:[%s2456_s11] sm:$0xff] %v1787_v18  ;;  %v886_v22 = vmul.f32 1.442695, %v885_v20  ;;  %v1084_v18 = vsub.s32 3, %v2398_v7  ;;  %v1073_v20 = vrot.slane %v1068_v17, %v747_v8  ;;  %v1081_v21 = vrot.slane %v1068_v17, %v1080_v16  ;;  %s2207_s8 = scalar_lea.vmem %s1624_s2, 448  ;;  %p2212_p2 = scmp.lt.s32.totalorder %s1624_s2, %s1624_s2 }
 0x1fd   :  { %p2208_p1 = scmp.ne.s32.totalorder %s1624_s2, %s2207_s8  ;;  %p2213_p3 = scmp.lt.s32.totalorder %s2207_s8, %s2207_s8 }
 0x1fe   :  { %2131 = vpow2.f32 %v886_v22  ;;  %v1077_v22 = vrot.slane %v1068_v17, %v751_v9 }
 0x1ff   :  { %p2214_p4 = por %p2213_p3, %p2212_p2 }
 0x201   :  { %p2215_p5 = pnand %p2214_p4, %p2208_p1 }
 0x20b   :  { %v2132_v24 = vpop.eup %2131 }
 0x20c   :  { %v888_v25 = vmul.f32 %v2132_v24, %v84_v23 }
 0x20e   :  { %v889_v26 = vadd.f32 %v888_v25, %v870_v15  ;;  %v2130_v15 = vld [vmem:[#allocation7 + $0x18] ss:$28 sps:$4 sm:$0xff]  }
 0x210   :  { %v890_v28 = vpack.c.bf16 %v889_v26, %v889_v26 }
 0x212   :  { %1922 = vmatmul.mubr.bf16.vlgmr.msra.gmra.mxu1 %v890_v28 }
 0x213   :  { %1435 = vmatpush1.bf16.msra.mxu1 %v2054_v27  ;;  %1466 = vmatprep.mubr.bf16.mxu1 %v2242_v19 }
 0x214   :  { %1436 = vmatprep.subr.bf16.mxu1 %v2062_v29 }
 0x217   :  { %1437 = vmatpush1.bf16.msra.mxu1 %v2060_v30 }
 0x218   :  { %1438 = vmatprep.subr.bf16.mxu1 %v2068_v31 }
 0x21b   :  { %1439 = vmatpush1.bf16.msra.mxu1 %v2066_v32 }
 0x21c   :  { %1440 = vmatprep.subr.bf16.mxu1 %v2074_v33 }
 0x21f   :  { %1441 = vmatpush1.bf16.msra.mxu1 %v2072_v34 }
 0x220   :  { %1442 = vmatprep.subr.bf16.mxu1 %v2080_v35 }
 0x223   :  { %1443 = vmatpush1.bf16.msra.mxu1 %v2078_v36 }
 0x224   :  { %1444 = vmatprep.subr.bf16.mxu1 %v2086_v37 }
 0x227   :  { %1445 = vmatpush1.bf16.msra.mxu1 %v2084_v38 }
 0x228   :  { %1446 = vmatprep.subr.bf16.mxu1 %v2092_v40 }
 0x22b   :  { %1447 = vmatpush1.bf16.msra.mxu1 %v2090_v41 }
 0x22c   :  { %1448 = vmatprep.subr.bf16.mxu1 %v2098_v43 }
 0x22f   :  { %1449 = vmatpush1.bf16.msra.mxu1 %v2096_v45 }
 0x230   :  { %1925 = vmatprep.subr.bf16.mxu1 %v2240_v39 }
 0x2d2   :  { %v996_v48 = vpop.f32.mrf.mxu1 }
 0x2d3   :  { %v997_v49 = vadd.f32 %v1718_v47, %v996_v48 }
 0x2d4   :  { %v1923_v50 = vpop.f32.mrf.mxu1 }
 0x2d5   :  { %v1002_v51 = vmax.f32 %v997_v49, 0.0 }
 0x2d6   :  { %v999_v52 = vpop.f32.mrf.mxu1 }
 0x2d7   :  { %v1003_v55 = vpack.c.bf16 %v1002_v51, %v1002_v51  ;;  %v1088_v51 = vsub.s32 4, %v2398_v7  ;;  %v1096_v52 = vsub.s32 6, %v2398_v7 }
 0x2d8   :  { %v1924_v57 = vpop.f32.mrf.mxu1 }
 0x2d9   :  { %1426 = vmatmul.mubr.bf16.vlgmr.msra.gmra.mxu0 %v1003_v55  ;;  %1467 = vmatmul.mubr.bf16.vlgmr.msra.gmra.mxu1 %v1003_v55 }
 0x2da   :  { %1476 = vmatpush1.bf16.msra.mxu0 %v2099_v53  ;;  %1926 = vmatpush3.bf16.msra.mxu1 %v2102_v54  ;;  %v1092_v54 = vsub.s32 5, %v2398_v7 }
 0x2db   :  { %1477 = vmatprep.subr.bf16.mxu0 %v2105_v56  ;;  %1927 = vmatprep.subr.bf16.mxu1 %v2240_v39  ;;  %v1097_v56 = vrot.slane %v1068_v17, %v1096_v52 }
 0x2dc   :  { %1507 = vmatprep.mubr.bf16.mxu0 %v2242_v19  ;;  %1941 = vmatprep.mubr.msk.bf16.mxu1 %vm2241_vm0, %v2240_v39  ;;  %v2115_v19 = vld [vmem:[#allocation7 + $0xb8] ss:$28 sps:$4 sm:$0xff]   ;;  %v1093_v57 = vrot.slane %v1068_v17, %v1092_v54 }
 0x2de   :  { %1478 = vmatpush1.bf16.msra.mxu0 %v2103_v58  ;;  %1928 = vmatpush3.bf16.msra.mxu1 %v2106_v59 }
 0x2df   :  { %1479 = vmatprep.subr.bf16.mxu0 %v2109_v60  ;;  %1929 = vmatprep.subr.bf16.mxu1 %v2240_v39 }
 0x2e2   :  { %1480 = vmatpush1.bf16.msra.mxu0 %v2107_v61  ;;  %1930 = vmatpush3.bf16.msra.mxu1 %v2110_v62 }
 0x2e3   :  { %1481 = vmatprep.subr.bf16.mxu0 %v2113_v63  ;;  %1931 = vmatprep.subr.bf16.mxu1 %v2240_v39 }
 0x2e6   :  { %1482 = vmatpush1.bf16.msra.mxu0 %v2111_v0  ;;  %1932 = vmatpush3.bf16.msra.mxu1 %v2114_v1 }
 0x2e7   :  { %1483 = vmatprep.subr.bf16.mxu0 %v2117_v2  ;;  %1933 = vmatprep.subr.bf16.mxu1 %v2240_v39 }
 0x2ea   :  { %1484 = vmatpush1.bf16.msra.mxu0 %v2115_v19  ;;  %1934 = vmatpush3.bf16.msra.mxu1 %v2118_v3 }
 0x2eb   :  { %1485 = vmatprep.subr.bf16.mxu0 %v2121_v4  ;;  %1935 = vmatprep.subr.bf16.mxu1 %v2240_v39 }
 0x2ee   :  { %1486 = vmatpush1.bf16.msra.mxu0 %v2119_v5  ;;  %1936 = vmatpush3.bf16.msra.mxu1 %v2122_v6 }
 0x2ef   :  { %1487 = vmatprep.subr.bf16.mxu0 %v2125_v10  ;;  %1937 = vmatprep.subr.bf16.mxu1 %v2240_v39 }
 0x2f2   :  { %1488 = vmatpush1.bf16.msra.mxu0 %v2123_v11  ;;  %1938 = vmatpush3.bf16.msra.mxu1 %v2126_v12 }
 0x2f3   :  { %1489 = vmatprep.subr.bf16.mxu0 %v2129_v13  ;;  %1939 = vmatprep.subr.bf16.mxu1 %v2240_v39  ;;  %v1085_v39 = vrot.slane %v1068_v17, %v1084_v18 }
 0x2f6   :  { %1490 = vmatpush1.bf16.msra.mxu0 %v2127_v14  ;;  %1940 = vmatpush3.bf16.msra.mxu1 %v2130_v15 }
 0x2f9   :  { %1508 = vmatmul.mubr.bf16.vlgmr.msra.gmra.mxu0 %v1003_v55  ;;  %1942 = vmatmul.mubr.bf16.vlgmr.msra.gmra.mxu1 %v1003_v55  ;;  %v1089_v55 = vrot.slane %v1068_v17, %v1088_v51 }
 0x399   :  { %v1427_v23 = vpop.f32.mrf.mxu0  ;;  %v1468_v24 = vpop.f32.mrf.mxu1 }
 0x39a   :  { %v1428_v25 = vadd.f32 %v1427_v23, %v1073_v20  ;;  %v1469_v26 = vadd.f32 %v1468_v24, %v1081_v21 }
 0x39b   :  { %v1429_v27 = vpop.f32.mrf.mxu0  ;;  %v1470_v28 = vpop.f32.mrf.mxu1 }
 0x39c   :  { %v1556_v29 = vmul.f32 0.5, %v1428_v25  ;;  %v1558_v30 = vmul.f32 0.5, %v1469_v26  ;;  %v1430_v31 = vadd.f32 %v1429_v27, %v1077_v22  ;;  %v1471_v32 = vadd.f32 %v1470_v28, %v1085_v39 }
 0x39d   :  { %v1431_v33 = vpop.f32.mrf.mxu0  ;;  %v1472_v34 = vpop.f32.mrf.mxu1 }
 0x39e   :  { %2133 = vtanh.f32 %v1556_v29  ;;  %v1557_v35 = vmul.f32 0.5, %v1430_v31  ;;  %v1559_v8 = vmul.f32 0.5, %v1471_v32 }
 0x39f   :  { %2135 = vtanh.f32 %v1558_v30  ;;  %v1432_v36 = vpop.f32.mrf.mxu0  ;;  %v1473_v37 = vpop.f32.mrf.mxu1 }
 0x3a0   :  { %2137 = vtanh.f32 %v1557_v35 }
 0x3a1   :  { %2139 = vtanh.f32 %v1559_v8 }
 0x3ab   :  { %v2134_v9 = vpop.eup %2133 }
 0x3ac   :  { %v2136_v38 = vpop.eup %2135  ;;  %v1570_v40 = vmul.f32 0.5, %v2134_v9 }
 0x3ad   :  { %v2138_v41 = vpop.eup %2137  ;;  %v1572_v42 = vmul.f32 0.5, %v2136_v38 }
 0x3ae   :  { %v2140_v43 = vpop.eup %2139  ;;  %v1571_v44 = vmul.f32 0.5, %v2138_v41  ;;  %v1577_v46 = vadd.f32 0.5, %v1570_v40 }
 0x3af   :  { %v1573_v45 = vmul.f32 0.5, %v2140_v43  ;;  %v1579_v48 = vadd.f32 0.5, %v1572_v42 }
 0x3b0   :  { %v1578_v47 = vadd.f32 0.5, %v1571_v44 }
 0x3b1   :  { %v1580_v49 = vadd.f32 0.5, %v1573_v45 }
 0x3b2   :  { %v1788_v50 = vpack.c.bf16 %v1578_v47, %v1577_v46 }
 0x3b3   :  { %v1789_v53 = vpack.c.bf16 %v1580_v49, %v1579_v48 }
 0x3b4   :  { %1613 = vst [vmem:[#allocation8] sm:$0xff] %v1788_v50 }
 0x3b5   :  { %1614 = vst [vmem:[#allocation8 + $0x8] sm:$0xff] %v1789_v53 }
 0x3b9   :  { %v1509_v58 = vpop.f32.mrf.mxu0  ;;  %v1550_v59 = vpop.f32.mrf.mxu1 }
 0x3ba   :  { %v1510_v60 = vadd.f32 %v1509_v58, %v1089_v55  ;;  %v1551_v61 = vadd.f32 %v1550_v59, %v1097_v56 }
 0x3bb   :  { %v1511_v62 = vpop.f32.mrf.mxu0  ;;  %v1943_v63 = vpop.f32.mrf.mxu1 }
 0x3bc   :  { %v1560_v0 = vmul.f32 0.5, %v1510_v60  ;;  %v1562_v1 = vmul.f32 0.5, %v1551_v61  ;;  %v1512_v2 = vadd.f32 %v1511_v62, %v1093_v57 }
 0x3bd   :  { %v1513_v19 = vpop.f32.mrf.mxu0  ;;  %v1553_v3 = vpop.f32.mrf.mxu1 }
 0x3be   :  { %2141 = vtanh.f32 %v1560_v0  ;;  %v1561_v4 = vmul.f32 0.5, %v1512_v2 }
 0x3bf   :  { %2143 = vtanh.f32 %v1562_v1  ;;  %v1514_v5 = vpop.f32.mrf.mxu0  ;;  %v1944_v7 = vpop.f32.mrf.mxu1 }
 0x3c0   :  { %2145 = vtanh.f32 %v1561_v4 }
 0x3cb   :  { %v2142_v6 = vpop.eup %2141 }
 0x3cc   :  { %v2144_v10 = vpop.eup %2143  ;;  %v1574_v11 = vmul.f32 0.5, %v2142_v6 }
 0x3cd   :  { %v2146_v12 = vpop.eup %2145  ;;  %v1576_v13 = vmul.f32 0.5, %v2144_v10 }
 0x3ce   :  { %v1575_v14 = vmul.f32 0.5, %v2146_v12  ;;  %v1581_v16 = vadd.f32 0.5, %v1574_v11 }
 0x3cf   :  { %v1583_v15 = vadd.f32 0.5, %v1576_v13 }
 0x3d0   :  { %v1582_v17 = vadd.f32 0.5, %v1575_v14 }
 0x3d1   :  { %v1791_v18 = vpack.c.bf16 %v1583_v15, %v1583_v15 }
 0x3d2   :  { %v1790_v20 = vpack.c.bf16 %v1582_v17, %v1581_v16 }
 0x3d3   :  { %1616 = vst [vmem:[#allocation8 + $0x18] sm:$0xf] %v1791_v18 }
 0x3d4   :  { %1615 = vst [vmem:[#allocation8 + $0x10] sm:$0xff] %v1790_v20 }
 0x3d5   :  { %2218 = shalt.err (!%p2215_p5)
}
 0x3d6   :  { %1626 = dma.vmem_to_hbm [thread:$0]  %s1624_s2, 448, %s2455_s10, [#allocation4]  }
 0x3d7   :  { %2231 = dma.done.wait [#allocation4], 448  }
 0x3d8   :  { %2232 = vsyncadd [#allocation4], 4294966848 }
 0x3d9   :  { %1634 = vsyncpa [#allocation3], 1 }
 0x3da   :  { %1635 = vsyncpa [#allocation6], 1 }
 0x3db   :  { %1636 = vsyncpa [#allocation4], 1 }

</bundles_post_ra>
